<compile_context>
chip_gen: v5e
topology: v5e:2x2
jax: 0.10.0
libtpu: 0.0.40
codegen_flags: <defaults>
</compile_context>

<pallas_src>
import math

import jax
import jax.numpy as jnp
from jax.experimental import pallas as pl
from jax.experimental.pallas import tpu as pltpu

LANE = 128                  # last dim must stay a multiple of 128 (vreg lanes)
SUBLANE = 8                 # second-to-last dim multiple for f32
DEFAULT_WIDTH = 512         # lane-dense slab width (multiple of 128)
DEFAULT_BLOCK_ROWS = 1024   # (1024, 512) f32 tile = 2 MiB per buffer


def _round_up(n: int, m: int) -> int:
    return ((n + m - 1) // m) * m


def _linear_kernel(w_ref, b_ref, x_ref, o_ref):
    # w_ref, b_ref: (1, 1) f32 scalars resident in SMEM.
    # x_ref, o_ref: (block_rows, width) VMEM tiles.
    # Pure VPU fused multiply-add in f32; cast only on the store.
    w = w_ref[0, 0]
    b = b_ref[0, 0]
    y = x_ref[...].astype(jnp.float32) * w + b
    o_ref[...] = y.astype(o_ref.dtype)


def linear_regression_forward(x, weight, bias, *, width=DEFAULT_WIDTH,
                              block_rows=DEFAULT_BLOCK_ROWS):
    """nn.Linear(1, 1) forward: x (B, 1), weight (1, 1), bias (1,) -> (B, 1)."""
    B, in_features = x.shape
    out_features = weight.shape[0]
    assert in_features == 1 and out_features == 1 and bias.shape == (1,)
    assert width % LANE == 0

    # Lane-dense layout: view the (B, 1) column as a (rows, width) slab.
    flat = x.reshape(-1)
    n = flat.shape[0]
    pad = (-n) % width
    if pad:
        # Only the tail is padded (single small pad); skipped entirely when
        # n is already a multiple of the slab width.
        flat = jnp.pad(flat, (0, pad))
    rows = flat.shape[0] // width
    x2d = flat.reshape(rows, width)

    if rows <= block_rows:
        # Single block covering the whole array (block dims == full dims).
        br = rows
        grid = (1,)
    else:
        # 2 MiB-class tiles; ragged last block is masked by Pallas.
        br = _round_up(block_rows, SUBLANE)
        grid = (pl.cdiv(rows, br),)

    # Keep the scalars (and the FMA) in f32 regardless of the input dtype.
    w2d = weight.reshape(1, 1).astype(jnp.float32)   # -> SMEM scalar
    b2d = bias.reshape(1, 1).astype(jnp.float32)     # -> SMEM scalar

    out2d = pl.pallas_call(
        _linear_kernel,
        out_shape=jax.ShapeDtypeStruct((rows, width), x.dtype),
        grid=grid,
        in_specs=[
            pl.BlockSpec(memory_space=pltpu.MemorySpace.SMEM),   # weight scalar
            pl.BlockSpec(memory_space=pltpu.MemorySpace.SMEM),   # bias scalar
            pl.BlockSpec((br, width), lambda i: (i, 0)),         # x tile
        ],
        out_specs=pl.BlockSpec((br, width), lambda i: (i, 0)),
        compiler_params=pltpu.CompilerParams(
            dimension_semantics=("parallel",)   # split row grid across TCs (v7x)
        ),
    )(w2d, b2d, x2d)

    out_flat = out2d.reshape(-1)
    if pad:
        out_flat = out_flat[:n]
    return out_flat.reshape(B, out_features)


def init_params(key):
    # Deterministic init mimicking torch.nn.Linear's default:
    # U(-1/sqrt(in_features), 1/sqrt(in_features)) with in_features = 1.
    k_w, k_b = jax.random.split(key)
    bound = 1.0 / math.sqrt(1.0)
    weight = jax.random.uniform(k_w, (1, 1), jnp.float32, -bound, bound)
    bias = jax.random.uniform(k_b, (1,), jnp.float32, -bound, bound)
    return weight, bias


if __name__ == "__main__":
    key = jax.random.PRNGKey(0)
    k_x, k_x2, k_x3, k_p = jax.random.split(key, 4)
    weight, bias = init_params(k_p)

    # Small batch (single block, tail-padded path).
    B = 8
    x = jax.random.normal(k_x, (B, 1), jnp.float32)
    out = jax.block_until_ready(linear_regression_forward(x, weight, bias))
    ref = x @ weight.T + bias
    assert out.shape == (B, 1)
    assert jnp.allclose(out, ref, atol=1e-6), "mismatch vs reference (B=8)"

    # Non-multiple-of-width batch to exercise the padded-tail path.
    B2 = 1000
    x2 = jax.random.normal(k_x2, (B2, 1), jnp.float32)
    out2 = jax.block_until_ready(linear_regression_forward(x2, weight, bias))
    ref2 = x2 @ weight.T + bias
    assert out2.shape == (B2, 1)
    assert jnp.allclose(out2, ref2, atol=1e-6), "mismatch vs reference (B=1000)"

    # Width-aligned batch (no pad, no slice) exercising a multi-step grid with
    # a ragged last block (rows=40 > br=16 when block_rows is forced small).
    B3 = 40 * 512
    x3 = jax.random.normal(k_x3, (B3, 1), jnp.float32)
    out3 = jax.block_until_ready(
        linear_regression_forward(x3, weight, bias, block_rows=16))
    ref3 = x3 @ weight.T + bias
    assert out3.shape == (B3, 1)
    assert jnp.allclose(out3, ref3, atol=1e-6), "mismatch vs reference (B=20480)"

    print("KERNEL_OK")
</pallas_src>

<mosaic_0001>
module attributes {stable_mosaic.version = 11 : i64} {
  func.func @_linear_kernel(%arg0: i32, %arg1: memref<1x1xf32, #tpu.memory_space<smem>>, %arg2: memref<1x1xf32, #tpu.memory_space<smem>>, %arg3: memref<1x512xf32, #tpu.memory_space<vmem>>, %arg4: memref<1x512xf32, #tpu.memory_space<vmem>>) attributes {dimension_semantics = [#tpu.dimension_semantics<parallel>], iteration_bounds = array<i64: 1>, scalar_prefetch = 0 : i64, scratch_operands = 0 : i64, tpu.core_type = #tpu.core_type<tc>, window_params = [{transform_indices = @transform_0, window_bounds = array<i64: 1, 1>}, {transform_indices = @transform_1, window_bounds = array<i64: 1, 1>}, {transform_indices = @transform_2, window_bounds = array<i64: 1, 512>}, {transform_indices = @transform_3, window_bounds = array<i64: 1, 512>}]} {
    %c0 = arith.constant 0 : index
    %c0_0 = arith.constant 0 : index
    %0 = memref.load %arg1[%c0, %c0_0] : memref<1x1xf32, #tpu.memory_space<smem>>
    %c0_1 = arith.constant 0 : index
    %c0_2 = arith.constant 0 : index
    %1 = memref.load %arg2[%c0_1, %c0_2] : memref<1x1xf32, #tpu.memory_space<smem>>
    %c0_3 = arith.constant 0 : index
    %c0_4 = arith.constant 0 : index
    %2 = vector.load %arg3[%c0_3, %c0_4] : memref<1x512xf32, #tpu.memory_space<vmem>>, vector<1x512xf32>
    %3 = vector.broadcast %0 : f32 to vector<1x512xf32>
    %4 = arith.mulf %2, %3 : vector<1x512xf32>
    %5 = vector.broadcast %1 : f32 to vector<1x512xf32>
    %6 = arith.addf %4, %5 : vector<1x512xf32>
    %c0_5 = arith.constant 0 : index
    %c0_6 = arith.constant 0 : index
    %7 = vector.load %arg4[%c0_5, %c0_6] : memref<1x512xf32, #tpu.memory_space<vmem>>, vector<1x512xf32>
    tpu.vector_store %arg4[%c0_5, %c0_6], %6 {strides = array<i32>} : memref<1x512xf32, #tpu.memory_space<vmem>>, vector<1x512xf32>,
    return
  }
  func.func @transform_0(%arg0: i32) -> (i32, i32) {
    %c0_i32 = arith.constant 0 : i32
    %c0_i32_0 = arith.constant 0 : i32
    %c0_i32_1 = arith.constant 0 : i32
    return %c0_i32, %c0_i32_0 : i32, i32
  }
  func.func @transform_1(%arg0: i32) -> (i32, i32) {
    %c0_i32 = arith.constant 0 : i32
    %c0_i32_0 = arith.constant 0 : i32
    %c0_i32_1 = arith.constant 0 : i32
    return %c0_i32, %c0_i32_0 : i32, i32
  }
  func.func @transform_2(%arg0: i32) -> (i32, i32) {
    %c0_i32 = arith.constant 0 : i32
    %c0_i32_0 = arith.constant 0 : i32
    return %arg0, %c0_i32 : i32, i32
  }
  func.func @transform_3(%arg0: i32) -> (i32, i32) {
    %c0_i32 = arith.constant 0 : i32
    %c0_i32_0 = arith.constant 0 : i32
    return %arg0, %c0_i32 : i32, i32
  }
}

</mosaic_0001>

<bundles_post_ra>
// kernel: tpu_custom_call.1
= control target key start
LH: loop header
LB: loop body
LE: loop exit
PB: predicated region body
PF: predicated region fallthrough
CT: control target
= control target key end

     0   :  { %v24_v3 = vlaneseq  ;;  %s105_s0 = inlined_call_operand.<no memory space> [shape: f32[1,1], index: 0, kind: input, shape index: {}]   ;;  %s106_s1 = inlined_call_operand.<no memory space> [shape: f32[1,1], index: 1, kind: input, shape index: {}]   ;;  %s107_s2 = inlined_call_operand.vmem [shape: f32[1,512], index: 2, kind: input, shape index: {}]   ;;  %s108_s3 = inlined_call_operand.hbm [shape: f32[1,512], index: 3, kind: output, shape index: {}]  }
   0x1   :  { %v19_v0 = vld [vmem:[%s107_s2] sm:$0xf]  ;;  %v20_v1 = vstv %s105_s0  ;;  %v22_v2 = vstv %s106_s1 }
   0x2   :  { %10 = vsyncpa [#allocation5], 0  ;;  %s36_s20 = sshll.u32 %s108_s3, 4  ;;  %v21_v4 = vmul.f32 %v20_v1, %v19_v0  ;;  %s72_s21 = smov [#allocation4]   ;;  %vm26_vm0 = vcmp.lt.s32.totalorder %v24_v3, 512  ;;  %s37_s20 = int_to_ptr.hbm [resolvable:$true] %s36_s20 }
   0x3   :  { %s34_s22 = sshll.u32 %s72_s21, 4  ;;  %s35_s22 = int_to_ptr.vmem [resolvable:$true] %s34_s22 }
   0x4   :  { %v23_v5 = vadd.f32 %v22_v2, %v21_v4 }
   0x6   :  { %28 = vst.msk [vmem:[#allocation4] sm:$0xf] %vm26_vm0, %v23_v5 }
   0x7   :  { %39 = dma.vmem_to_hbm [thread:$0]  %s35_s22, 64, %s37_s20, [#allocation5]  }
   0x8   :  { %70 = dma.done.wait [#allocation5], 64  }
   0x9   :  { %71 = vsyncadd [#allocation5], 4294967232 }
   0xa   :  { %44 = vsyncpa [#allocation5], 1 }

</bundles_post_ra>
